<compile_context>
chip_gen: v7x
topology: tpu7x:2x2x1
jax: 0.10.0
libtpu: 0.0.40
codegen_flags: <defaults>
</compile_context>

<pallas_src>
import math

import jax
import jax.numpy as jnp
from jax.experimental import pallas as pl
from jax.experimental.pallas import tpu as pltpu


_MIB = 1024 * 1024
_VMEM_CAP = 56 * _MIB         # stay inside v7x's 64 MiB physical VMEM
_XW_RESIDENT_MAX = 8 * _MIB   # keep xW fully VMEM-resident if (2x-buffered) it fits here


def _round_up(v, m):
    return ((v + m - 1) // m) * m


def _cdiv(a, b):
    return -(-a // b)


def _make_gcn_kernel(x_resident, tile_k):
    """out = relu((adj @ xW) + b); k-reduction tiled with an f32 VMEM accumulator."""

    def kernel(adj_ref, xw_ref, b_ref, out_ref, acc_ref):
        k = pl.program_id(1)

        @pl.when(k == 0)
        def _init():
            acc_ref[...] = jnp.zeros_like(acc_ref)

        if x_resident:
            # xW lives fully in VMEM: slice the k-slab locally, no HBM re-read.
            start = pl.multiple_of(k * tile_k, tile_k)
            xw_k = xw_ref[pl.ds(start, tile_k), :]
        else:
            xw_k = xw_ref[...]

        # aggregate: (tile_n, tile_k) @ (tile_k, ft_ot_p) -> f32 accumulator  [MXU]
        acc_ref[...] += jnp.dot(adj_ref[...], xw_k,
                                preferred_element_type=jnp.float32)

        @pl.when(k == pl.num_programs(1) - 1)
        def _finalize():
            # bias + relu once per row tile.                                 [VPU]
            out_ref[...] = jnp.maximum(acc_ref[...] + b_ref[...], 0.0
                                       ).astype(out_ref.dtype)

    return kernel


def _vmem_bytes(tile_n, tile_k, n_kpad, ft_ot_p, x_itemsize, out_itemsize,
                x_resident):
    adj_b = 2 * tile_n * tile_k * x_itemsize                       # double-buffered stream
    xw_b = 2 * (n_kpad if x_resident else tile_k) * ft_ot_p * x_itemsize
    bias_b = 2 * ft_ot_p * 4
    acc_b = tile_n * ft_ot_p * 4
    out_b = 2 * tile_n * ft_ot_p * out_itemsize
    return adj_b + xw_b + bias_b + acc_b + out_b


def gcn_layer(adj, node_fts, weight, bias, *, tile_n=512, tile_k=512,
              compute_dtype=jnp.bfloat16, out_dtype=None, x_resident=None):
    """adj: [N, N], node_fts: [N, ft_in], weight: [ft_ot, ft_in], bias: [ft_ot]."""
    N = adj.shape[0]
    ft_in = node_fts.shape[1]
    ft_ot = weight.shape[0]
    out_dtype = node_fts.dtype if out_dtype is None else out_dtype
    x_itemsize = jnp.dtype(compute_dtype).itemsize
    out_itemsize = jnp.dtype(out_dtype).itemsize

    # Dropout p=0.0 in the reference module -> identity; nothing to do.

    # ---- tile selection ------------------------------------------------------
    ft_ot_p = _round_up(ft_ot, 128)                     # lane-dense xW / output width
    tile_n = max(8, min(tile_n, _round_up(N, 8)))       # sublane-aligned row tile
    tile_k = max(128, min(tile_k, _round_up(N, 128)))   # lane-aligned contraction tile
    # v7x has 2 TensorCores: keep >= 2 row tiles when N allows, so the
    # "parallel" grid axis actually shards across both cores.
    if N >= 512 and _cdiv(N, tile_n) < 2:
        tile_n = max(256, _round_up(_cdiv(N, 2), 8))

    n_rpad = _round_up(N, tile_n)                       # adj rows / output rows
    n_kpad = _round_up(N, tile_k)                       # contraction dim of adj @ xW

    # xW fully VMEM-resident when small: kills the per-row-tile k-slab re-read
    # that previously doubled HBM traffic on this memory-bound kernel.
    if x_resident is None:
        x_resident = 2 * n_kpad * ft_ot_p * x_itemsize <= _XW_RESIDENT_MAX

    # Auto-shrink tiles until the buffer sum fits v7x's 64 MiB VMEM budget
    # (v5e/v6e have 128 MiB, so v7x is the binding constraint).
    while (_vmem_bytes(tile_n, tile_k, n_kpad, ft_ot_p, x_itemsize,
                       out_itemsize, x_resident) > _VMEM_CAP
           and (tile_k > 128 or tile_n > 8)):
        if tile_k > 128:
            tile_k = max(128, _round_up(tile_k // 2, 128))
            n_kpad = _round_up(N, tile_k)
        else:
            tile_n = max(8, _round_up(tile_n // 2, 8))
            n_rpad = _round_up(N, tile_n)

    vmem_needed = _vmem_bytes(tile_n, tile_k, n_kpad, ft_ot_p, x_itemsize,
                              out_itemsize, x_resident)
    vmem_limit = int(min(_VMEM_CAP, max(32 * _MIB, vmem_needed + 8 * _MIB)))

    # ---- operand prep (single fused pad-of-cast; cache adj_p across layers) --
    # Hoist the weight matmul: (adj @ x) @ W.T == adj @ (x @ W.T).
    xw = jnp.dot(node_fts, weight.T, preferred_element_type=jnp.float32,
                 precision=jax.lax.Precision.HIGHEST)               # [N, ft_ot] f32
    xw_p = jnp.pad(xw.astype(compute_dtype),
                   ((0, n_kpad - N), (0, ft_ot_p - ft_ot)))
    adj_p = jnp.pad(adj.astype(compute_dtype),
                    ((0, n_rpad - N), (0, n_kpad - N)))
    b_p = jnp.pad(bias.astype(jnp.float32), (0, ft_ot_p - ft_ot)).reshape(1, ft_ot_p)

    grid = (n_rpad // tile_n, n_kpad // tile_k)

    if x_resident:
        xw_spec = pl.BlockSpec((n_kpad, ft_ot_p), lambda i, k: (0, 0))   # resident
    else:
        xw_spec = pl.BlockSpec((tile_k, ft_ot_p), lambda i, k: (k, 0))   # streamed k-slab

    out_p = pl.pallas_call(
        _make_gcn_kernel(x_resident, tile_k),
        out_shape=jax.ShapeDtypeStruct((n_rpad, ft_ot_p), out_dtype),
        grid_spec=pltpu.PrefetchScalarGridSpec(
            num_scalar_prefetch=0,
            grid=grid,
            in_specs=[
                pl.BlockSpec((tile_n, tile_k), lambda i, k: (i, k)),     # adj stream
                xw_spec,                                                 # xW
                pl.BlockSpec((1, ft_ot_p), lambda i, k: (0, 0)),         # bias resident
            ],
            out_specs=pl.BlockSpec((tile_n, ft_ot_p), lambda i, k: (i, 0)),
            scratch_shapes=[pltpu.VMEM((tile_n, ft_ot_p), jnp.float32)],
        ),
        compiler_params=pltpu.CompilerParams(
            dimension_semantics=("parallel", "arbitrary"),
            vmem_limit_bytes=vmem_limit,
        ),
    )(adj_p, xw_p, b_p)

    # Strip padding. Padded rows hold relu(bias) != 0 and MUST be sliced off.
    return out_p[:N, :ft_ot]


def init_params(key, ft_in, ft_ot):
    """Deterministic init matching GCN_layer._reset_parameters."""
    kw, kb = jax.random.split(key)
    # xavier_uniform_ on weight [ft_ot, ft_in]: bound = sqrt(6 / (fan_in + fan_out))
    bound_w = math.sqrt(6.0 / (ft_in + ft_ot))
    weight = jax.random.uniform(kw, (ft_ot, ft_in), jnp.float32,
                                minval=-bound_w, maxval=bound_w)
    # bias ~ U(-stdev, stdev), stdev = 1 / sqrt(ft_in)
    stdev = 1.0 / math.sqrt(ft_in)
    bias = jax.random.uniform(kb, (ft_ot,), jnp.float32,
                              minval=-stdev, maxval=stdev)
    return weight, bias


if __name__ == "__main__":
    N, FT_IN, FT_OT = 512, 64, 96   # 2 row tiles (megacore), padded feature dims exercised

    key = jax.random.PRNGKey(0)
    k_adj, k_x, k_param = jax.random.split(key, 3)

    # Symmetric row-normalized adjacency with self loops (dense stand-in for sparse adj).
    raw = (jax.random.uniform(k_adj, (N, N)) > 0.95).astype(jnp.float32)
    raw = jnp.maximum(raw, raw.T) + jnp.eye(N, dtype=jnp.float32)
    deg = jnp.sum(raw, axis=1, keepdims=True)
    adj = raw / deg

    node_fts = jax.random.normal(k_x, (N, FT_IN), jnp.float32)
    weight, bias = init_params(k_param, FT_IN, FT_OT)

    # Reference in plain JAX (dropout p=0.0 -> identity), full precision matmuls.
    ref_h = jnp.dot(adj, node_fts, precision=jax.lax.Precision.HIGHEST)
    ref = jnp.maximum(
        jnp.dot(ref_h, weight.T, precision=jax.lax.Precision.HIGHEST) + bias, 0.0)

    # f32 path: tight check of tiling / accumulation / hoisted-matmul logic.
    out_f32 = jax.block_until_ready(
        gcn_layer(adj, node_fts, weight, bias, compute_dtype=jnp.float32))
    assert out_f32.shape == (N, FT_OT)
    assert jnp.allclose(out_f32, ref, atol=1e-3, rtol=1e-3)

    # Default bf16 streaming path (xW VMEM-resident): f32 accumulation,
    # relaxed tolerance for the deliberate bf16 quantization of adj / xW.
    out_bf16 = jax.block_until_ready(gcn_layer(adj, node_fts, weight, bias))
    assert out_bf16.shape == (N, FT_OT)
    assert jnp.allclose(out_bf16, ref, atol=5e-2, rtol=5e-2)

    # Forced streamed-xW fallback (exercised when N*ft_ot is too big for VMEM).
    out_stream = jax.block_until_ready(
        gcn_layer(adj, node_fts, weight, bias, x_resident=False))
    assert jnp.allclose(out_stream, ref, atol=5e-2, rtol=5e-2)

    print("KERNEL_OK")
</pallas_src>

<mosaic_0001>
module attributes {stable_mosaic.version = 11 : i64} {
  func.func @kernel(%arg0: i32, %arg1: i32, %arg2: memref<256x512xf32, #tpu.memory_space<vmem>>, %arg3: memref<512x128xf32, #tpu.memory_space<vmem>>, %arg4: memref<1x128xf32, #tpu.memory_space<vmem>>, %arg5: memref<256x128xf32, #tpu.memory_space<vmem>>, %arg6: memref<256x128xf32, #tpu.memory_space<vmem>>) attributes {dimension_semantics = [#tpu.dimension_semantics<parallel>, #tpu.dimension_semantics<arbitrary>], iteration_bounds = array<i64: 2, 1>, scalar_prefetch = 0 : i64, scratch_operands = 1 : i64, tpu.core_type = #tpu.core_type<tc>, window_params = [{transform_indices = @transform_0, window_bounds = array<i64: 256, 512>}, {pipeline_mode = #tpu.pipeline_mode<synchronous>, transform_indices = @transform_1, window_bounds = array<i64: 512, 128>}, {pipeline_mode = #tpu.pipeline_mode<synchronous>, transform_indices = @transform_2, window_bounds = array<i64: 1, 128>}, {transform_indices = @transform_3, window_bounds = array<i64: 256, 128>}]} {
    %c0_i32 = arith.constant 0 : i32
    %0 = arith.cmpi eq, %arg1, %c0_i32 : i32
    %1 = arith.extui %0 : i1 to i32
    %c0_i32_0 = arith.constant 0 : i32
    %2 = arith.cmpi ne, %1, %c0_i32_0 : i32
    scf.if %2 {
      %cst_9 = arith.constant 0.000000e+00 : f32
      %15 = vector.broadcast %cst_9 : f32 to vector<256x128xf32>
      %c0_10 = arith.constant 0 : index
      %c0_11 = arith.constant 0 : index
      %16 = vector.load %arg6[%c0_10, %c0_11] : memref<256x128xf32, #tpu.memory_space<vmem>>, vector<256x128xf32>
      tpu.vector_store %arg6[%c0_10, %c0_11], %15 {strides = array<i32>} : memref<256x128xf32, #tpu.memory_space<vmem>>, vector<256x128xf32>,
    } else {
    }
    %c512_i32 = arith.constant 512 : i32
    %3 = arith.muli %arg1, %c512_i32 : i32
    %4 = tpu.assume_multiple %3, 512 : i32
    %5 = arith.index_cast %4 : i32 to index
    %c0 = arith.constant 0 : index
    %6 = vector.load %arg3[%5, %c0] : memref<512x128xf32, #tpu.memory_space<vmem>>, vector<512x128xf32>
    %c0_1 = arith.constant 0 : index
    %c0_2 = arith.constant 0 : index
    %7 = vector.load %arg6[%c0_1, %c0_2] : memref<256x128xf32, #tpu.memory_space<vmem>>, vector<256x128xf32>
    %c0_3 = arith.constant 0 : index
    %c0_4 = arith.constant 0 : index
    %8 = vector.load %arg2[%c0_3, %c0_4] : memref<256x512xf32, #tpu.memory_space<vmem>>, vector<256x512xf32>
    %cst = arith.constant dense<0.000000e+00> : vector<256x128xf32>
    %9 = tpu.matmul %8, %6, %cst {dimension_numbers = #tpu.dot_dimension_numbers<[1], [0], [0], [1], [0, 0, 1, 1], [], []>} : vector<256x512xf32>, vector<512x128xf32>, vector<256x128xf32> -> vector<256x128xf32>
    %10 = arith.addf %7, %9 : vector<256x128xf32>
    %c0_5 = arith.constant 0 : index
    %c0_6 = arith.constant 0 : index
    %11 = vector.load %arg6[%c0_5, %c0_6] : memref<256x128xf32, #tpu.memory_space<vmem>>, vector<256x128xf32>
    tpu.vector_store %arg6[%c0_5, %c0_6], %10 {strides = array<i32>} : memref<256x128xf32, #tpu.memory_space<vmem>>, vector<256x128xf32>,
    %c0_i32_7 = arith.constant 0 : i32
    %12 = arith.cmpi eq, %arg1, %c0_i32_7 : i32
    %13 = arith.extui %12 : i1 to i32
    %c0_i32_8 = arith.constant 0 : i32
    %14 = arith.cmpi ne, %13, %c0_i32_8 : i32
    scf.if %14 {
      %c0_9 = arith.constant 0 : index
      %c0_10 = arith.constant 0 : index
      %15 = vector.load %arg6[%c0_9, %c0_10] : memref<256x128xf32, #tpu.memory_space<vmem>>, vector<256x128xf32>
      %c0_11 = arith.constant 0 : index
      %c0_12 = arith.constant 0 : index
      %16 = vector.load %arg4[%c0_11, %c0_12] : memref<1x128xf32, #tpu.memory_space<vmem>>, vector<1x128xf32>
      %17 = vector.broadcast %16 : vector<1x128xf32> to vector<256x128xf32>
      %18 = arith.addf %15, %17 : vector<256x128xf32>
      %cst_13 = arith.constant 0.000000e+00 : f32
      %19 = vector.broadcast %cst_13 : f32 to vector<256x128xf32>
      %20 = arith.maximumf %18, %19 : vector<256x128xf32>
      %c0_14 = arith.constant 0 : index
      %c0_15 = arith.constant 0 : index
      %21 = vector.load %arg5[%c0_14, %c0_15] : memref<256x128xf32, #tpu.memory_space<vmem>>, vector<256x128xf32>
      tpu.vector_store %arg5[%c0_14, %c0_15], %20 {strides = array<i32>} : memref<256x128xf32, #tpu.memory_space<vmem>>, vector<256x128xf32>,
    } else {
    }
    return
  }
  func.func @transform_0(%arg0: i32, %arg1: i32) -> (i32, i32) {
    %c0_i32 = arith.constant 0 : i32
    return %arg0, %arg1 : i32, i32
  }
  func.func @transform_1(%arg0: i32, %arg1: i32) -> (i32, i32) {
    %c0_i32 = arith.constant 0 : i32
    %c0_i32_0 = arith.constant 0 : i32
    %c0_i32_1 = arith.constant 0 : i32
    return %c0_i32, %c0_i32_0 : i32, i32
  }
  func.func @transform_2(%arg0: i32, %arg1: i32) -> (i32, i32) {
    %c0_i32 = arith.constant 0 : i32
    %c0_i32_0 = arith.constant 0 : i32
    %c0_i32_1 = arith.constant 0 : i32
    return %c0_i32, %c0_i32_0 : i32, i32
  }
  func.func @transform_3(%arg0: i32, %arg1: i32) -> (i32, i32) {
    %c0_i32 = arith.constant 0 : i32
    %c0_i32_0 = arith.constant 0 : i32
    return %arg0, %c0_i32 : i32, i32
  }
}

</mosaic_0001>

<bundles_post_ra>
// kernel: tpu_custom_call.1
= control target key start
LH: loop header
LB: loop body
LE: loop exit
PB: predicated region body
PF: predicated region fallthrough
CT: control target
= control target key end

     0   :  { %8 = vsyncpa [#allocation4], 0  ;;  %s2076_s0 = inlined_call_operand.hbm [shape: f32[512,512], index: 0, kind: input, shape index: {}]   ;;  %s2077_s1 = inlined_call_operand.hbm [shape: f32[512,128], index: 1, kind: input, shape index: {}]   ;;  %s2078_s2 = inlined_call_operand.vmem [shape: f32[1,128], index: 2, kind: input, shape index: {}]   ;;  %s2079_s3 = inlined_call_operand.hbm [shape: f32[512,128], index: 3, kind: output, shape index: {}]  }
   0x1   :  { %10 = vsyncpa [#allocation4 + $0x1], 0 }
   0x2   :  { %11 = vsyncpa [#allocation7], 0 }
   0x3   :  { %12 = vsyncpa [#allocation5], 0 }
   0x4   :  { %14 = vsyncpa [#allocation5 + $0x1], 0  ;;  %s1622_s12 = smov 0   ;;  %s1624_s13 = smov 0  }
   0x5   :  { %s1626_s14 = smov 0   ;;  %s1628_s15 = smov 0  }
   0x6   :  { %s1630_s16 = smov 0   ;;  %s1632_s17 = smov 0  }
   0x7 LB: > { %s1248_s18 = sadd.s32 4294967295, %s1590_s17   ;;  %s1249_s19 = sadd.s32 4294967294, %s1590_s17   ;;  %s1590_s17 = sphi %s1632_s17, %s20_s17   ;;  %s1586_s16 = sphi %s1630_s16, %s2103_s16   ;;  %s1582_s15 = sphi %s1628_s15, %s2102_s15   ;;  %s1578_s14 = sphi %s1626_s14, %s2101_s14   ;;  %s1574_s13 = sphi %s1624_s13, %s2100_s13   ;;  %s1570_s12 = sphi %s1622_s12, %s2099_s12  }
   0x8   : > { %p54_p0 = scmp.ne.s32.totalorder %s1574_s13, %s1570_s12  ;;  %p1656_p1 = scmp.eq.s32.totalorder %s1248_s18, 0 }
   0x9   : > { %p1660_p2 = scmp.eq.s32.totalorder %s1248_s18, 1  ;;  %p126_p3 = scmp.eq.s32.totalorder %s1249_s19, 1 }
   0xa   : > { %s2084_s20 = scalar_select %p1656_p1, 1, 0 }
   0xb   : > { %s2085_s21 = scalar_select %p1660_p2, 1, 0 }
   0xc   : > { %p1666_p4 = por %p1656_p1, %p54_p0  ;;  %p1250_p5 = scmp.ge.s32.totalorder %s1590_s17, 1 }
   0xd   : > { %p1671_p6 = por %p126_p3, %p54_p0  ;;  %p133_p7 = scmp.lt.s32.totalorder %s1590_s17, 3 }
   0xe   : > { %s2086_s22 = scalar_select %p1666_p4, 1, 0 }
   0xf   : > { %s2087_s23 = scalar_select %p1671_p6, 1, 0 }
  0x10   : > { %p1676_p8 = pnand %p1250_p5, %p133_p7  ;;  %s1592_s25 = smov [#allocation6]  }
  0x11   : > { %s145_s26 = sshll.u32 %s1592_s25, 4  ;;  %s32_s28 = sadd.s32 1, %s1586_s16  ;;  %s146_s26 = int_to_ptr.vmem [resolvable:$true] %s145_s26 }
  0x12   : > { %s2088_s24 = scalar_select %p1676_p8, 1, 0 }
  0x13   : > { %p1374_p9 = pneg %p1676_p8  ;;  %s1446_s4 = scalar_lea.hbm %s2077_s1, 8192 }
  0x14   : > { %p1447_p12 = scmp.ne.s32.totalorder %s2077_s1, %s1446_s4  ;;  %p1453_p5 = scmp.lt.u32.totalorder %s1446_s4, %s2077_s1 }
  0x15   : > { %p1685_p11 = pnand %p1374_p9, %p1656_p1 }
  0x17   : > { %p1448_p13 = pneg %p1685_p11 }
  0x19   : > { %p1449_p0 = pnand %p1448_p13, %p1447_p12 }
  0x1b   : > { %p1450_p3 = pneg %p1449_p0 }
  0x1d   : > { %p1455_p7 = pnand %p1453_p5, %p1450_p3 }
  0x1f   : > { %1458 = shalt.err (!%p1455_p7)
}
  0x20   : > { %s1459_s9 = scalar_lea.vmem %s146_s26, 8192  ;;  %p1467_p1 = scmp.lt.s32.totalorder %s146_s26, %s146_s26 }
  0x21   : > { %p1460_p9 = scmp.ne.s32.totalorder %s146_s26, %s1459_s9  ;;  %p1468_p4 = scmp.lt.s32.totalorder %s1459_s9, %s1459_s9 }
  0x23   : > { %p1462_p10 = pnand %p1460_p9, %p1448_p13  ;;  %p1469_p8 = por %p1468_p4, %p1467_p1 }
  0x25   : > { %p1463_p6 = pneg %p1462_p10 }
  0x27   : > { %p1470_p2 = pnand %p1469_p8, %p1463_p6 }
  0x29   : > { %1473 = shalt.err (!%p1470_p2)
}
  0x2a   : > { %s1593_s10 = smov 128   ;;  %s1594_s11 = smov 8  }
  0x2b   : > { %1377 = dma.hbm_to_vmem [thread:$0]  (!%p1685_p11), %s2077_s1, 8192, %s146_s26, [#allocation7], %s1593_s10, %s1593_s10, %s1594_s11  }
  0x2c   : > { %p34_p1 = scmp.ge.s32.totalorder %s32_s28, 2  ;;  %s41_s25 = sadd.s32 1, %s1578_s14 }
  0x2d   : > { %p48_p2 = scmp.ne.s32.totalorder %s1578_s14, %s1574_s13  ;;  %p49_p4 = scmp.eq.s32.totalorder %s1590_s17, 0 }
  0x2e   : > { %s2105_s28 = smov (%p34_p1, %s32_s28), 0  ;;  %p2091_p8 = scmp.ne.s32.totalorder %s2085_s21, 0 }
  0x2f   : > { %p1712_p6 = por %p49_p4, %p48_p2  ;;  %s36_s27 = ssub.s32 %s1586_s16, %s2105_s28 }
  0x30   : > { %p1718_p10 = por %p2091_p8, %p48_p2  ;;  %p1387_p12 = scmp.lt.s32.totalorder %s1590_s17, 2 }
  0x31   : > { %p39_p11 = scmp.eq.s32.totalorder %s36_s27, 0  ;;  %s162_s26 = sand.u32 1, %s1578_s14  }
  0x32   : > { %s1253_s4 = sshll.u32 %s162_s26, 10  ;;  %s1268_s6 = sshll.u32 %s1586_s16, 14 }
  0x33   : > { %s1727_s5 = scalar_select %p39_p11, %s1578_s14, %s41_s25  }
  0x34   : > { %s1733_s9 = scalar_lea.hbm %s2076_s0, %s1268_s6  ;;  %s166_s21 = scalar_lea.vmem [#allocation3], %s1253_s4 }
  0x35   : > { %s176_s10 = sshll.u32 %s166_s21, 4  ;;  %p1739_p13 = pnand %p1387_p12, %p1712_p6  ;;  %s1735_s10 = int_to_ptr.vmem [resolvable:$true] %s176_s10 }
  0x36   : > { %s1743_s18 = scalar_lea.sflag [#allocation4], %s162_s26  ;;  %s1474_s19 = scalar_lea.hbm %s1733_s9, 16384 }
  0x37   : > { %p1475_p0 = scmp.ne.s32.totalorder %s1733_s9, %s1474_s19  ;;  %p1476_p3 = pneg %p1739_p13 }
  0x38   : > { %s1479_s29 = scalar_lea.hbm %s2076_s0, 32768  ;;  %p1480_p9 = scmp.lt.u32.totalorder %s1733_s9, %s2076_s0 }
  0x39   : > { %p1477_p5 = pnand %p1476_p3, %p1475_p0  ;;  %p1481_p1 = scmp.lt.u32.totalorder %s1479_s29, %s1474_s19 }
  0x3a   : > { %p1483_p4 = scmp.lt.u32.totalorder %s1474_s19, %s1733_s9 }
  0x3b   : > { %p1478_p7 = pneg %p1477_p5  ;;  %p1482_p2 = por %p1481_p1, %p1480_p9 }
  0x3d   : > { %p1484_p6 = por %p1483_p4, %p1482_p2 }
  0x3f   : > { %p1485_p8 = pnand %p1484_p6, %p1478_p7 }
  0x41   : > { %1488 = shalt.err (!%p1485_p8)
}
  0x42   : > { %s1489_s26 = scalar_lea.vmem %s1735_s10, 16384  ;;  %s1595_s7 = smov [#allocation3]  }
  0x43   : > { %p1490_p12 = scmp.ne.s32.totalorder %s1735_s10, %s1489_s26  ;;  %s1494_s8 = sshll.u32 %s1595_s7, 4  ;;  %s1495_s8 = int_to_ptr.vmem [resolvable:$false] %s1494_s8 }
  0x44   : > { %s1496_s21 = scalar_lea.vmem %s1495_s8, 32768  ;;  %p1497_p5 = scmp.lt.s32.totalorder %s1735_s10, %s1495_s8 }
  0x45   : > { %p1492_p11 = pnand %p1490_p12, %p1476_p3  ;;  %p1498_p9 = scmp.lt.s32.totalorder %s1496_s21, %s1489_s26 }
  0x47   : > { %p1493_p0 = pneg %p1492_p11  ;;  %p1499_p1 = por %p1498_p9, %p1497_p5 }
  0x49   : > { %p1500_p2 = pnand %p1499_p1, %p1493_p0 }
  0x4b   : > { %1503 = shalt.err (!%p1500_p2)
}
  0x4c   : > { %s1596_s19 = smov 512   ;;  %s1597_s25 = smov 32  }
  0x4d   : > { %1381 = dma.hbm_to_vmem [thread:$0]  (!%p1739_p13), %s1733_s9, 16384, %s1735_s10, %s1743_s18, %s1596_s19, %s1596_s19, %s1597_s25  }
  0x4e   : > { %p2094_p3 = scmp.ne.s32.totalorder %s2088_s24, 0 }
  0x4f   : > { %s1774_s27 = sand.u32 (!%p2094_p3), 1, %s1574_s13   ;;  %p2095_p7 = scmp.ne.s32.totalorder (!%p2094_p3), %s2086_s22, 0 }
  0x50   : > { %188 = sbr.rel (%p2094_p3) target bundleno = 515 (0x203), region = 32  ;;  %s1258_s29 = sshll.u32 (!%p2094_p3), %s1774_s27, 10 }
  0x51   : > { %s191_s4 = scalar_lea.sflag (!%p2094_p3), [#allocation4], %s1774_s27  ;;  %s1778_s6 = scalar_lea.vmem (!%p2094_p3), [#allocation3], %s1258_s29 }
  0x57   : > { %1557 = dma.done.wait (%p2095_p7), %s191_s4, 16384  }
  0x58   : > { %1559 = vsyncadd (%p2095_p7), %s191_s4, 4294950912  ;;  %p2096_p13 = scmp.ne.s32.totalorder %s2084_s20, 0 }
  0x5a   : > { %1561 = dma.done.wait (%p2096_p13), [#allocation7], 8192  }
  0x5b   : > { %1563 = vsyncadd (%p2096_p13), [#allocation7], 4294959104  ;;  %v1598_v0 = vmov 0.0|0.0   ;;  %v262_v1 = vld [vmem:[#allocation6] sm:$0xff]  ;;  %v263_v2 = vld [vmem:[#allocation6 + $0x8] sm:$0xff]  ;;  %s1260_s24 = sshll.u32 %s1774_s27, 8 }
  0x5c   : > { %1270 = vmatprep.subr.bf16.mxu0 %v1598_v0  ;;  %1318 = vmatprep.subr.bf16.mxu1 %v1598_v0  ;;  %v294_v3 = vld [vmem:[#allocation6 + $0x100] sm:$0xff]  ;;  %v1271_v4 = vpack.c.bf16 %v263_v2, %v262_v1  ;;  %v295_v5 = vld [vmem:[#allocation6 + $0x108] sm:$0xff]  ;;  %v264_v6 = vld [vmem:[#allocation6 + $0x10] sm:$0xff]  ;;  %s1955_s9 = scalar_lea.vmem [#allocation8], %s1260_s24  ;;  %s1269_s10 = sshll.u32 %s1582_s15, 12 }
  0x5d   : > { %v265_v7 = vld [vmem:[#allocation6 + $0x18] sm:$0xff]  ;;  %v1319_v8 = vpack.c.bf16 %v295_v5, %v294_v3  ;;  %v296_v9 = vld [vmem:[#allocation6 + $0x110] sm:$0xff]  ;;  %v266_v13 = vld [vmem:[#allocation6 + $0x20] sm:$0xff]  ;;  %s1152_s11 = sshll.u32 %s1955_s9, 4  ;;  %s2024_s7 = scalar_lea.hbm %s2079_s3, %s1269_s10  ;;  %s2026_s11 = int_to_ptr.vmem [resolvable:$true] %s1152_s11 }
  0x5e   : > { %v297_v10 = vld [vmem:[#allocation6 + $0x118] sm:$0xff]  ;;  %1272 = vmatpush1.bf16.msra.mxu0 %v1271_v4  ;;  %v1274_v11 = vpack.c.bf16 %v265_v7, %v264_v6  ;;  %v267_v14 = vld [vmem:[#allocation6 + $0x28] sm:$0xff]  ;;  %v298_v15 = vld [vmem:[#allocation6 + $0x120] sm:$0xff]  ;;  %s1139_s8 = scalar_lea.sflag [#allocation5], %s1774_s27  ;;  %s1504_s21 = scalar_lea.vmem %s2026_s11, 4096 }
  0x5f   : > { %1320 = vmatpush1.bf16.msra.mxu1 %v1319_v8  ;;  %1273 = vmatprep.subr.bf16.mxu0 %v1598_v0  ;;  %v1322_v12 = vpack.c.bf16 %v297_v10, %v296_v9  ;;  %v299_v16 = vld [vmem:[#allocation6 + $0x128] sm:$0xff]  ;;  %v1277_v17 = vpack.c.bf16 %v267_v14, %v266_v13  ;;  %v268_v19 = vld [vmem:[#allocation6 + $0x30] sm:$0xff]  ;;  %v269_v20 = vld [vmem:[#allocation6 + $0x38] sm:$0xff]  ;;  %p1505_p4 = scmp.ne.s32.totalorder %s2026_s11, %s1504_s21  ;;  %s1599_s15 = smov [#allocation8]  }
  0x60   : > { %1321 = vmatprep.subr.bf16.mxu1 %v1598_v0  ;;  %v1325_v18 = vpack.c.bf16 %v299_v16, %v298_v15  ;;  %v300_v21 = vld [vmem:[#allocation6 + $0x130] sm:$0xff]  ;;  %v301_v22 = vld [vmem:[#allocation6 + $0x138] sm:$0xff]  ;;  %v1280_v23 = vpack.c.bf16 %v269_v20, %v268_v19  ;;  %v270_v25 = vld [vmem:[#allocation6 + $0x40] sm:$0xff]  ;;  %s1508_s19 = sshll.u32 %s1599_s15, 4  ;;  %s1509_s19 = int_to_ptr.vmem [resolvable:$false] %s1508_s19 }
  0x61   : > { %v1328_v24 = vpack.c.bf16 %v301_v22, %v300_v21  ;;  %v271_v26 = vld [vmem:[#allocation6 + $0x48] sm:$0xff]  ;;  %v302_v27 = vld [vmem:[#allocation6 + $0x140] sm:$0xff]  ;;  %v272_v31 = vld [vmem:[#allocation6 + $0x50] sm:$0xff]  ;;  %p1506_p6 = pnand %p1505_p4, %p1718_p10  ;;  %s1510_s25 = scalar_lea.vmem %s1509_s19, 8192 }
  0x62   : > { %1275 = vmatpush1.bf16.msra.mxu0 %v1274_v11  ;;  %v303_v28 = vld [vmem:[#allocation6 + $0x148] sm:$0xff]  ;;  %v1283_v29 = vpack.c.bf16 %v271_v26, %v270_v25  ;;  %v273_v32 = vld [vmem:[#allocation6 + $0x58] sm:$0xff]  ;;  %v304_v33 = vld [vmem:[#allocation6 + $0x150] sm:$0xff]  ;;  %p1511_p12 = scmp.lt.s32.totalorder %s2026_s11, %s1509_s19  ;;  %p1512_p11 = scmp.lt.s32.totalorder %s1510_s25, %s1504_s21 }
  0x63   : > { %1323 = vmatpush1.bf16.msra.mxu1 %v1322_v12  ;;  %1276 = vmatprep.subr.bf16.mxu0 %v1598_v0  ;;  %v1331_v30 = vpack.c.bf16 %v303_v28, %v302_v27  ;;  %v305_v34 = vld [vmem:[#allocation6 + $0x158] sm:$0xff]  ;;  %v1286_v35 = vpack.c.bf16 %v273_v32, %v272_v31  ;;  %v274_v37 = vld [vmem:[#allocation6 + $0x60] sm:$0xff]  ;;  %v275_v38 = vld [vmem:[#allocation6 + $0x68] sm:$0xff]  ;;  %p1507_p8 = pneg %p1506_p6 }
  0x64   : > { %1324 = vmatprep.subr.bf16.mxu1 %v1598_v0  ;;  %v1334_v36 = vpack.c.bf16 %v305_v34, %v304_v33  ;;  %v306_v39 = vld [vmem:[#allocation6 + $0x160] sm:$0xff]  ;;  %v307_v40 = vld [vmem:[#allocation6 + $0x168] sm:$0xff]  ;;  %v361_v42 = vld [vmem:[%s1778_s6 + $0x18] sm:$0xff]  ;;  %v1289_v43 = vpack.c.bf16 %v275_v38, %v274_v37  ;;  %p1513_p0 = por %p1512_p11, %p1511_p12 }
  0x65   : > { %v359_v41 = vld [vmem:[%s1778_s6 + $0x8] sm:$0xff]  ;;  %775 = vmatprep.mubr.f32.mxu1 %v361_v42  ;;  %v1337_v44 = vpack.c.bf16 %v307_v40, %v306_v39  ;;  %v276_v45 = vld [vmem:[#allocation6 + $0x70] sm:$0xff]  ;;  %v277_v46 = vld [vmem:[#allocation6 + $0x78] sm:$0xff] }
  0x66   : > { %1278 = vmatpush1.bf16.msra.mxu0 %v1277_v17  ;;  %550 = vmatprep.mubr.f32.mxu0 %v359_v41  ;;  %v308_v47 = vld [vmem:[#allocation6 + $0x170] sm:$0xff]  ;;  %v309_v48 = vld [vmem:[#allocation6 + $0x178] sm:$0xff]  ;;  %v1292_v49 = vpack.c.bf16 %v277_v46, %v276_v45  ;;  %v278_v51 = vld [vmem:[#allocation6 + $0x80] sm:$0xff]  ;;  %p1514_p5 = pnand %p1513_p0, %p1507_p8 }
  0x67   : > { %1326 = vmatpush1.bf16.msra.mxu1 %v1325_v18  ;;  %1279 = vmatprep.subr.bf16.mxu0 %v1598_v0  ;;  %v1340_v50 = vpack.c.bf16 %v309_v48, %v308_v47  ;;  %v279_v52 = vld [vmem:[#allocation6 + $0x88] sm:$0xff]  ;;  %v310_v53 = vld [vmem:[#allocation6 + $0x180] sm:$0xff]  ;;  %v280_v57 = vld [vmem:[#allocation6 + $0x90] sm:$0xff] }
  0x68   : > { %1327 = vmatprep.subr.bf16.mxu1 %v1598_v0  ;;  %v311_v54 = vld [vmem:[#allocation6 + $0x188] sm:$0xff]  ;;  %v1295_v55 = vpack.c.bf16 %v279_v52, %v278_v51  ;;  %v281_v58 = vld [vmem:[#allocation6 + $0x98] sm:$0xff]  ;;  %v312_v59 = vld [vmem:[#allocation6 + $0x190] sm:$0xff] }
  0x69   : > { %v1343_v56 = vpack.c.bf16 %v311_v54, %v310_v53  ;;  %v313_v60 = vld [vmem:[#allocation6 + $0x198] sm:$0xff]  ;;  %v1298_v61 = vpack.c.bf16 %v281_v58, %v280_v57  ;;  %v282_v63 = vld [vmem:[#allocation6 + $0xa0] sm:$0xff]  ;;  %v283_v1 = vld [vmem:[#allocation6 + $0xa8] sm:$0xff] }
  0x6a   : > { %1281 = vmatpush1.bf16.msra.mxu0 %v1280_v23  ;;  %v1346_v62 = vpack.c.bf16 %v313_v60, %v312_v59  ;;  %v314_v2 = vld [vmem:[#allocation6 + $0x1a0] sm:$0xff]  ;;  %v315_v3 = vld [vmem:[#allocation6 + $0x1a8] sm:$0xff]  ;;  %v1301_v4 = vpack.c.bf16 %v283_v1, %v282_v63  ;;  %v284_v6 = vld [vmem:[#allocation6 + $0xb0] sm:$0xff] }
  0x6b   : > { %1329 = vmatpush1.bf16.msra.mxu1 %v1328_v24  ;;  %1282 = vmatprep.subr.bf16.mxu0 %v1598_v0  ;;  %v1349_v5 = vpack.c.bf16 %v315_v3, %v314_v2  ;;  %v285_v7 = vld [vmem:[#allocation6 + $0xb8] sm:$0xff]  ;;  %v316_v8 = vld [vmem:[#allocation6 + $0x1b0] sm:$0xff]  ;;  %v286_v12 = vld [vmem:[#allocation6 + $0xc0] sm:$0xff] }
  0x6c   : > { %1330 = vmatprep.subr.bf16.mxu1 %v1598_v0  ;;  %v317_v9 = vld [vmem:[#allocation6 + $0x1b8] sm:$0xff]  ;;  %v1304_v10 = vpack.c.bf16 %v285_v7, %v284_v6  ;;  %v287_v13 = vld [vmem:[#allocation6 + $0xc8] sm:$0xff]  ;;  %v318_v14 = vld [vmem:[#allocation6 + $0x1c0] sm:$0xff] }
  0x6d   : > { %v1352_v11 = vpack.c.bf16 %v317_v9, %v316_v8  ;;  %v319_v15 = vld [vmem:[#allocation6 + $0x1c8] sm:$0xff]  ;;  %v1307_v16 = vpack.c.bf16 %v287_v13, %v286_v12  ;;  %v288_v18 = vld [vmem:[#allocation6 + $0xd0] sm:$0xff]  ;;  %v289_v19 = vld [vmem:[#allocation6 + $0xd8] sm:$0xff] }
  0x6e   : > { %1284 = vmatpush1.bf16.msra.mxu0 %v1283_v29  ;;  %v1355_v17 = vpack.c.bf16 %v319_v15, %v318_v14  ;;  %v320_v20 = vld [vmem:[#allocation6 + $0x1d0] sm:$0xff]  ;;  %v321_v21 = vld [vmem:[#allocation6 + $0x1d8] sm:$0xff]  ;;  %v1310_v22 = vpack.c.bf16 %v289_v19, %v288_v18  ;;  %v290_v24 = vld [vmem:[#allocation6 + $0xe0] sm:$0xff] }
  0x6f   : > { %1332 = vmatpush1.bf16.msra.mxu1 %v1331_v30  ;;  %1285 = vmatprep.subr.bf16.mxu0 %v1598_v0  ;;  %v1358_v23 = vpack.c.bf16 %v321_v21, %v320_v20  ;;  %v291_v25 = vld [vmem:[#allocation6 + $0xe8] sm:$0xff]  ;;  %v322_v26 = vld [vmem:[#allocation6 + $0x1e0] sm:$0xff]  ;;  %v292_v30 = vld [vmem:[#allocation6 + $0xf0] sm:$0xff] }
  0x70   : > { %1333 = vmatprep.subr.bf16.mxu1 %v1598_v0  ;;  %v323_v27 = vld [vmem:[#allocation6 + $0x1e8] sm:$0xff]  ;;  %v1313_v28 = vpack.c.bf16 %v291_v25, %v290_v24  ;;  %v293_v31 = vld [vmem:[#allocation6 + $0xf8] sm:$0xff]  ;;  %v324_v32 = vld [vmem:[#allocation6 + $0x1f0] sm:$0xff] }
  0x71   : > { %v1361_v29 = vpack.c.bf16 %v323_v27, %v322_v26  ;;  %v325_v33 = vld [vmem:[#allocation6 + $0x1f8] sm:$0xff]  ;;  %v1316_v34 = vpack.c.bf16 %v293_v31, %v292_v30  ;;  %v360_v37 = vld [vmem:[%s1778_s6 + $0x10] sm:$0xff]  ;;  %v363_v38 = vld [vmem:[%s1778_s6 + $0x28] sm:$0xff] }
  0x72   : > { %1287 = vmatpush1.bf16.msra.mxu0 %v1286_v35  ;;  %v1364_v35 = vpack.c.bf16 %v325_v33, %v324_v32  ;;  %v365_v39 = vld [vmem:[%s1778_s6 + $0x38] sm:$0xff]  ;;  %v362_v40 = vld [vmem:[%s1778_s6 + $0x20] sm:$0xff]  ;;  %v364_v41 = vld [vmem:[%s1778_s6 + $0x30] sm:$0xff] }
  0x73   : > { %1335 = vmatpush1.bf16.msra.mxu1 %v1334_v36  ;;  %1288 = vmatprep.subr.bf16.mxu0 %v1598_v0  ;;  %v358_v36 = vld [vmem:[%s1778_s6] sm:$0xff]  ;;  %v367_v42 = vld [vmem:[%s1778_s6 + $0x48] sm:$0xff]  ;;  %v373_v46 = vld [vmem:[%s1778_s6 + $0x78] sm:$0xff] }
  0x74   : > { %1336 = vmatprep.subr.bf16.mxu1 %v1598_v0  ;;  %v371_v45 = vld [vmem:[%s1778_s6 + $0x68] sm:$0xff]  ;;  %v370_v47 = vld [vmem:[%s1778_s6 + $0x60] sm:$0xff]  ;;  %v372_v48 = vld [vmem:[%s1778_s6 + $0x70] sm:$0xff] }
  0x75   : > { %v374_v51 = vld [vmem:[%s1778_s6 + $0x80] sm:$0xff]  ;;  %v376_v52 = vld [vmem:[%s1778_s6 + $0x90] sm:$0xff]  ;;  %v379_v53 = vld [vmem:[%s1778_s6 + $0xa8] sm:$0xff] }
  0x76   : > { %1290 = vmatpush1.bf16.msra.mxu0 %v1289_v43  ;;  %v366_v43 = vld [vmem:[%s1778_s6 + $0x40] sm:$0xff]  ;;  %v381_v54 = vld [vmem:[%s1778_s6 + $0xb8] sm:$0xff]  ;;  %v383_v57 = vld [vmem:[%s1778_s6 + $0xc8] sm:$0xff] }
  0x77   : > { %1338 = vmatpush1.bf16.msra.mxu1 %v1337_v44  ;;  %1291 = vmatprep.subr.bf16.mxu0 %v1598_v0  ;;  %v368_v44 = vld [vmem:[%s1778_s6 + $0x50] sm:$0xff]  ;;  %v385_v58 = vld [vmem:[%s1778_s6 + $0xd8] sm:$0xff]  ;;  %v382_v59 = vld [vmem:[%s1778_s6 + $0xc0] sm:$0xff] }
  0x78   : > { %1339 = vmatprep.subr.bf16.mxu1 %v1598_v0  ;;  %v384_v60 = vld [vmem:[%s1778_s6 + $0xd0] sm:$0xff]  ;;  %v386_v63 = vld [vmem:[%s1778_s6 + $0xe0] sm:$0xff]  ;;  %v391_v2 = vld [vmem:[%s1778_s6 + $0x108] sm:$0xff] }
  0x79   : > { %v388_v1 = vld [vmem:[%s1778_s6 + $0xf0] sm:$0xff]  ;;  %v393_v3 = vld [vmem:[%s1778_s6 + $0x118] sm:$0xff]  ;;  %v395_v6 = vld [vmem:[%s1778_s6 + $0x128] sm:$0xff] }
  0x7a   : > { %1293 = vmatpush1.bf16.msra.mxu0 %v1292_v49  ;;  %v375_v49 = vld [vmem:[%s1778_s6 + $0x88] sm:$0xff]  ;;  %v397_v7 = vld [vmem:[%s1778_s6 + $0x138] sm:$0xff]  ;;  %v394_v8 = vld [vmem:[%s1778_s6 + $0x120] sm:$0xff] }
  0x7b   : > { %1341 = vmatpush1.bf16.msra.mxu1 %v1340_v50  ;;  %1294 = vmatprep.subr.bf16.mxu0 %v1598_v0  ;;  %v377_v50 = vld [vmem:[%s1778_s6 + $0x98] sm:$0xff]  ;;  %v396_v9 = vld [vmem:[%s1778_s6 + $0x130] sm:$0xff]  ;;  %v398_v12 = vld [vmem:[%s1778_s6 + $0x140] sm:$0xff] }
  0x7c   : > { %1342 = vmatprep.subr.bf16.mxu1 %v1598_v0  ;;  %v400_v13 = vld [vmem:[%s1778_s6 + $0x150] sm:$0xff]  ;;  %v403_v14 = vld [vmem:[%s1778_s6 + $0x168] sm:$0xff]  ;;  %v405_v15 = vld [vmem:[%s1778_s6 + $0x178] sm:$0xff] }
  0x7d   : > { %v407_v18 = vld [vmem:[%s1778_s6 + $0x188] sm:$0xff]  ;;  %v409_v19 = vld [vmem:[%s1778_s6 + $0x198] sm:$0xff]  ;;  %v406_v20 = vld [vmem:[%s1778_s6 + $0x180] sm:$0xff] }
  0x7e   : > { %1296 = vmatpush1.bf16.msra.mxu0 %v1295_v55  ;;  %v378_v55 = vld [vmem:[%s1778_s6 + $0xa0] sm:$0xff]  ;;  %v408_v21 = vld [vmem:[%s1778_s6 + $0x190] sm:$0xff]  ;;  %v415_v26 = vld [vmem:[%s1778_s6 + $0x1c8] sm:$0xff] }
  0x7f   : > { %1344 = vmatpush1.bf16.msra.mxu1 %v1343_v56  ;;  %1297 = vmatprep.subr.bf16.mxu0 %v1598_v0  ;;  %v380_v56 = vld [vmem:[%s1778_s6 + $0xb0] sm:$0xff]  ;;  %v410_v24 = vld [vmem:[%s1778_s6 + $0x1a0] sm:$0xff]  ;;  %v417_v27 = vld [vmem:[%s1778_s6 + $0x1d8] sm:$0xff] }
  0x80   : > { %1345 = vmatprep.subr.bf16.mxu1 %v1598_v0  ;;  %v412_v25 = vld [vmem:[%s1778_s6 + $0x1b0] sm:$0xff]  ;;  %v419_v30 = vld [vmem:[%s1778_s6 + $0x1e8] sm:$0xff]  ;;  %v421_v31 = vld [vmem:[%s1778_s6 + $0x1f8] sm:$0xff] }
  0x81   : > { %v418_v32 = vld [vmem:[%s1778_s6 + $0x1e0] sm:$0xff]  ;;  %v420_v33 = vld [vmem:[%s1778_s6 + $0x1f0] sm:$0xff] }
  0x82   : > { %1299 = vmatpush1.bf16.msra.mxu0 %v1298_v61  ;;  %v387_v61 = vld [vmem:[%s1778_s6 + $0xe8] sm:$0xff] }
  0x83   : > { %1347 = vmatpush1.bf16.msra.mxu1 %v1346_v62  ;;  %1300 = vmatprep.subr.bf16.mxu0 %v1598_v0  ;;  %v389_v62 = vld [vmem:[%s1778_s6 + $0xf8] sm:$0xff] }
  0x84   : > { %1348 = vmatprep.subr.bf16.mxu1 %v1598_v0 }
  0x86   : > { %1302 = vmatpush1.bf16.msra.mxu0 %v1301_v4  ;;  %v390_v4 = vld [vmem:[%s1778_s6 + $0x100] sm:$0xff] }
  0x87   : > { %1350 = vmatpush1.bf16.msra.mxu1 %v1349_v5  ;;  %1303 = vmatprep.subr.bf16.mxu0 %v1598_v0  ;;  %v392_v5 = vld [vmem:[%s1778_s6 + $0x110] sm:$0xff] }
  0x88   : > { %1351 = vmatprep.subr.bf16.mxu1 %v1598_v0 }
  0x8a   : > { %1305 = vmatpush1.bf16.msra.mxu0 %v1304_v10  ;;  %v399_v10 = vld [vmem:[%s1778_s6 + $0x148] sm:$0xff] }
  0x8b   : > { %1353 = vmatpush1.bf16.msra.mxu1 %v1352_v11  ;;  %1306 = vmatprep.subr.bf16.mxu0 %v1598_v0  ;;  %v401_v11 = vld [vmem:[%s1778_s6 + $0x158] sm:$0xff] }
  0x8c   : > { %1354 = vmatprep.subr.bf16.mxu1 %v1598_v0 }
  0x8e   : > { %1308 = vmatpush1.bf16.msra.mxu0 %v1307_v16  ;;  %v402_v16 = vld [vmem:[%s1778_s6 + $0x160] sm:$0xff] }
  0x8f   : > { %1356 = vmatpush1.bf16.msra.mxu1 %v1355_v17  ;;  %1309 = vmatprep.subr.bf16.mxu0 %v1598_v0  ;;  %v404_v17 = vld [vmem:[%s1778_s6 + $0x170] sm:$0xff] }
  0x90   : > { %1357 = vmatprep.subr.bf16.mxu1 %v1598_v0 }
  0x92   : > { %1311 = vmatpush1.bf16.msra.mxu0 %v1310_v22  ;;  %v411_v22 = vld [vmem:[%s1778_s6 + $0x1a8] sm:$0xff] }
  0x93   : > { %1359 = vmatpush1.bf16.msra.mxu1 %v1358_v23  ;;  %1312 = vmatprep.subr.bf16.mxu0 %v1598_v0  ;;  %v413_v23 = vld [vmem:[%s1778_s6 + $0x1b8] sm:$0xff] }
  0x94   : > { %1360 = vmatprep.subr.bf16.mxu1 %v1598_v0 }
  0x96   : > { %1314 = vmatpush1.bf16.msra.mxu0 %v1313_v28  ;;  %v414_v28 = vld [vmem:[%s1778_s6 + $0x1c0] sm:$0xff] }
  0x97   : > { %1362 = vmatpush1.bf16.msra.mxu1 %v1361_v29  ;;  %1315 = vmatprep.subr.bf16.mxu0 %v1598_v0  ;;  %v416_v29 = vld [vmem:[%s1778_s6 + $0x1d0] sm:$0xff] }
  0x98   : > { %1363 = vmatprep.subr.bf16.mxu1 %v1598_v0  ;;  %v369_v0 = vld [vmem:[%s1778_s6 + $0x58] sm:$0xff] }
  0x9a   : > { %1317 = vmatpush1.bf16.msra.mxu0 %v1316_v34  ;;  %v423_v34 = vld [vmem:[%s1778_s6 + $0x208] sm:$0xff] }
  0x9b   : > { %1365 = vmatpush1.bf16.msra.mxu1 %v1364_v35  ;;  %v425_v35 = vld [vmem:[%s1778_s6 + $0x218] sm:$0xff] }
  0x9d   : > { %551 = vmatmul.mubr.f32.vlgmr.msra.gmra.mrb[0].mxu0 %v358_v36  ;;  %v422_v36 = vld [vmem:[%s1778_s6 + $0x200] sm:$0xff] }
  0x9e   : > { %776 = vmatmul.mubr.f32.vlgmr.msra.gmra.mrb[0].mxu1 %v360_v37  ;;  %555 = vmatprep.mubr.f32.mxu0 %v363_v38  ;;  %v424_v37 = vld [vmem:[%s1778_s6 + $0x210] sm:$0xff]  ;;  %v427_v38 = vld [vmem:[%s1778_s6 + $0x228] sm:$0xff] }
  0x9f   : > { %780 = vmatprep.mubr.f32.mxu1 %v365_v39  ;;  %v429_v39 = vld [vmem:[%s1778_s6 + $0x238] sm:$0xff] }
  0xa1   : > { %556 = vmatmul.mubr.f32.gmra.mrb[2].mxu0 %v362_v40  ;;  %v426_v40 = vld [vmem:[%s1778_s6 + $0x220] sm:$0xff] }
  0xa2   : > { %781 = vmatmul.mubr.f32.gmra.mrb[2].mxu1 %v364_v41  ;;  %560 = vmatprep.mubr.f32.mxu0 %v367_v42  ;;  %v428_v41 = vld [vmem:[%s1778_s6 + $0x230] sm:$0xff]  ;;  %v431_v42 = vld [vmem:[%s1778_s6 + $0x248] sm:$0xff] }
  0xa3   : > { %785 = vmatprep.mubr.f32.mxu1 %v369_v0  ;;  %v433_v0 = vld [vmem:[%s1778_s6 + $0x258] sm:$0xff] }
  0xa5   : > { %561 = vmatmul.mubr.f32.gmra.mrb[4].mxu0 %v366_v43  ;;  %v430_v43 = vld [vmem:[%s1778_s6 + $0x240] sm:$0xff] }
  0xa6   : > { %786 = vmatmul.mubr.f32.gmra.mrb[4].mxu1 %v368_v44  ;;  %565 = vmatprep.mubr.f32.mxu0 %v371_v45  ;;  %v432_v44 = vld [vmem:[%s1778_s6 + $0x250] sm:$0xff]  ;;  %v435_v45 = vld [vmem:[%s1778_s6 + $0x268] sm:$0xff] }
  0xa7   : > { %790 = vmatprep.mubr.f32.mxu1 %v373_v46  ;;  %v437_v46 = vld [vmem:[%s1778_s6 + $0x278] sm:$0xff] }
  0xa9   : > { %566 = vmatmul.mubr.f32.gmra.mrb[6].mxu0 %v370_v47  ;;  %v434_v47 = vld [vmem:[%s1778_s6 + $0x260] sm:$0xff] }
  0xaa   : > { %791 = vmatmul.mubr.f32.gmra.mrb[6].mxu1 %v372_v48  ;;  %570 = vmatprep.mubr.f32.mxu0 %v375_v49  ;;  %v436_v48 = vld [vmem:[%s1778_s6 + $0x270] sm:$0xff]  ;;  %v439_v49 = vld [vmem:[%s1778_s6 + $0x288] sm:$0xff] }
  0xab   : > { %795 = vmatprep.mubr.f32.mxu1 %v377_v50  ;;  %v441_v50 = vld [vmem:[%s1778_s6 + $0x298] sm:$0xff] }
  0xad   : > { %571 = vmatmul.mubr.f32.gmra.mrb[8].mxu0 %v374_v51  ;;  %v438_v51 = vld [vmem:[%s1778_s6 + $0x280] sm:$0xff] }
  0xae   : > { %796 = vmatmul.mubr.f32.gmra.mrb[8].mxu1 %v376_v52  ;;  %575 = vmatprep.mubr.f32.mxu0 %v379_v53  ;;  %v440_v52 = vld [vmem:[%s1778_s6 + $0x290] sm:$0xff]  ;;  %v443_v53 = vld [vmem:[%s1778_s6 + $0x2a8] sm:$0xff] }
  0xaf   : > { %800 = vmatprep.mubr.f32.mxu1 %v381_v54  ;;  %v445_v54 = vld [vmem:[%s1778_s6 + $0x2b8] sm:$0xff] }
  0xb1   : > { %576 = vmatmul.mubr.f32.gmra.mrb[10].mxu0 %v378_v55  ;;  %v442_v55 = vld [vmem:[%s1778_s6 + $0x2a0] sm:$0xff] }
  0xb2   : > { %801 = vmatmul.mubr.f32.gmra.mrb[10].mxu1 %v380_v56  ;;  %580 = vmatprep.mubr.f32.mxu0 %v383_v57  ;;  %v444_v56 = vld [vmem:[%s1778_s6 + $0x2b0] sm:$0xff]  ;;  %v447_v57 = vld [vmem:[%s1778_s6 + $0x2c8] sm:$0xff] }
  0xb3   : > { %805 = vmatprep.mubr.f32.mxu1 %v385_v58  ;;  %v449_v58 = vld [vmem:[%s1778_s6 + $0x2d8] sm:$0xff] }
  0xb5   : > { %581 = vmatmul.mubr.f32.gmra.mrb[12].mxu0 %v382_v59  ;;  %v446_v59 = vld [vmem:[%s1778_s6 + $0x2c0] sm:$0xff] }
  0xb6   : > { %806 = vmatmul.mubr.f32.gmra.mrb[12].mxu1 %v384_v60  ;;  %585 = vmatprep.mubr.f32.mxu0 %v387_v61  ;;  %v448_v60 = vld [vmem:[%s1778_s6 + $0x2d0] sm:$0xff]  ;;  %v451_v61 = vld [vmem:[%s1778_s6 + $0x2e8] sm:$0xff] }
  0xb7   : > { %810 = vmatprep.mubr.f32.mxu1 %v389_v62  ;;  %v453_v62 = vld [vmem:[%s1778_s6 + $0x2f8] sm:$0xff] }
  0xb9   : > { %586 = vmatmul.mubr.f32.gmra.mrb[14].mxu0 %v386_v63  ;;  %v450_v63 = vld [vmem:[%s1778_s6 + $0x2e0] sm:$0xff] }
  0xba   : > { %811 = vmatmul.mubr.f32.gmra.mrb[14].mxu1 %v388_v1  ;;  %590 = vmatprep.mubr.f32.mxu0 %v391_v2  ;;  %v452_v1 = vld [vmem:[%s1778_s6 + $0x2f0] sm:$0xff]  ;;  %v455_v2 = vld [vmem:[%s1778_s6 + $0x308] sm:$0xff] }
  0xbb   : > { %815 = vmatprep.mubr.f32.mxu1 %v393_v3  ;;  %v457_v3 = vld [vmem:[%s1778_s6 + $0x318] sm:$0xff] }
  0xbd   : > { %591 = vmatmul.mubr.f32.gmra.mrb[16].mxu0 %v390_v4  ;;  %v454_v4 = vld [vmem:[%s1778_s6 + $0x300] sm:$0xff] }
  0xbe   : > { %816 = vmatmul.mubr.f32.gmra.mrb[16].mxu1 %v392_v5  ;;  %595 = vmatprep.mubr.f32.mxu0 %v395_v6  ;;  %v456_v5 = vld [vmem:[%s1778_s6 + $0x310] sm:$0xff]  ;;  %v459_v6 = vld [vmem:[%s1778_s6 + $0x328] sm:$0xff] }
  0xbf   : > { %820 = vmatprep.mubr.f32.mxu1 %v397_v7  ;;  %v461_v7 = vld [vmem:[%s1778_s6 + $0x338] sm:$0xff] }
  0xc1   : > { %596 = vmatmul.mubr.f32.gmra.mrb[18].mxu0 %v394_v8  ;;  %v458_v8 = vld [vmem:[%s1778_s6 + $0x320] sm:$0xff] }
  0xc2   : > { %821 = vmatmul.mubr.f32.gmra.mrb[18].mxu1 %v396_v9  ;;  %600 = vmatprep.mubr.f32.mxu0 %v399_v10  ;;  %v460_v9 = vld [vmem:[%s1778_s6 + $0x330] sm:$0xff]  ;;  %v463_v10 = vld [vmem:[%s1778_s6 + $0x348] sm:$0xff] }
  0xc3   : > { %825 = vmatprep.mubr.f32.mxu1 %v401_v11  ;;  %v465_v11 = vld [vmem:[%s1778_s6 + $0x358] sm:$0xff] }
  0xc5   : > { %601 = vmatmul.mubr.f32.gmra.mrb[20].mxu0 %v398_v12  ;;  %v462_v12 = vld [vmem:[%s1778_s6 + $0x340] sm:$0xff] }
  0xc6   : > { %826 = vmatmul.mubr.f32.gmra.mrb[20].mxu1 %v400_v13  ;;  %605 = vmatprep.mubr.f32.mxu0 %v403_v14  ;;  %v464_v13 = vld [vmem:[%s1778_s6 + $0x350] sm:$0xff]  ;;  %v467_v14 = vld [vmem:[%s1778_s6 + $0x368] sm:$0xff] }
  0xc7   : > { %830 = vmatprep.mubr.f32.mxu1 %v405_v15  ;;  %v469_v15 = vld [vmem:[%s1778_s6 + $0x378] sm:$0xff] }
  0xc9   : > { %606 = vmatmul.mubr.f32.gmra.mrb[22].mxu0 %v402_v16  ;;  %v466_v16 = vld [vmem:[%s1778_s6 + $0x360] sm:$0xff] }
  0xca   : > { %831 = vmatmul.mubr.f32.gmra.mrb[22].mxu1 %v404_v17  ;;  %610 = vmatprep.mubr.f32.mxu0 %v407_v18  ;;  %v468_v17 = vld [vmem:[%s1778_s6 + $0x370] sm:$0xff]  ;;  %v471_v18 = vld [vmem:[%s1778_s6 + $0x388] sm:$0xff] }
  0xcb   : > { %835 = vmatprep.mubr.f32.mxu1 %v409_v19  ;;  %v473_v19 = vld [vmem:[%s1778_s6 + $0x398] sm:$0xff] }
  0xcd   : > { %611 = vmatmul.mubr.f32.gmra.mrb[24].mxu0 %v406_v20  ;;  %v470_v20 = vld [vmem:[%s1778_s6 + $0x380] sm:$0xff] }
  0xce   : > { %836 = vmatmul.mubr.f32.gmra.mrb[24].mxu1 %v408_v21  ;;  %615 = vmatprep.mubr.f32.mxu0 %v411_v22  ;;  %v472_v21 = vld [vmem:[%s1778_s6 + $0x390] sm:$0xff]  ;;  %v475_v22 = vld [vmem:[%s1778_s6 + $0x3a8] sm:$0xff] }
  0xcf   : > { %840 = vmatprep.mubr.f32.mxu1 %v413_v23  ;;  %v477_v23 = vld [vmem:[%s1778_s6 + $0x3b8] sm:$0xff] }
  0xd1   : > { %616 = vmatmul.mubr.f32.gmra.mrb[26].mxu0 %v410_v24  ;;  %v474_v24 = vld [vmem:[%s1778_s6 + $0x3a0] sm:$0xff] }
  0xd2   : > { %841 = vmatmul.mubr.f32.gmra.mrb[26].mxu1 %v412_v25  ;;  %620 = vmatprep.mubr.f32.mxu0 %v415_v26  ;;  %v476_v25 = vld [vmem:[%s1778_s6 + $0x3b0] sm:$0xff]  ;;  %v479_v26 = vld [vmem:[%s1778_s6 + $0x3c8] sm:$0xff] }
  0xd3   : > { %845 = vmatprep.mubr.f32.mxu1 %v417_v27  ;;  %v481_v27 = vld [vmem:[%s1778_s6 + $0x3d8] sm:$0xff] }
  0xd5   : > { %621 = vmatmul.mubr.f32.gmra.mrb[28].mxu0 %v414_v28  ;;  %v478_v28 = vld [vmem:[%s1778_s6 + $0x3c0] sm:$0xff] }
  0xd6   : > { %846 = vmatmul.mubr.f32.gmra.mrb[28].mxu1 %v416_v29  ;;  %625 = vmatprep.mubr.f32.mxu0 %v419_v30  ;;  %v480_v29 = vld [vmem:[%s1778_s6 + $0x3d0] sm:$0xff]  ;;  %v483_v30 = vld [vmem:[%s1778_s6 + $0x3e8] sm:$0xff] }
  0xd7   : > { %850 = vmatprep.mubr.f32.mxu1 %v421_v31  ;;  %v485_v31 = vld [vmem:[%s1778_s6 + $0x3f8] sm:$0xff] }
  0xd9   : > { %626 = vmatmul.mubr.f32.gmra.mrb[30].mxu0 %v418_v32  ;;  %v482_v32 = vld [vmem:[%s1778_s6 + $0x3e0] sm:$0xff] }
  0xda   : > { %851 = vmatmul.mubr.f32.gmra.mrb[30].mxu1 %v420_v33  ;;  %630 = vmatprep.mubr.f32.mxu0 %v423_v34  ;;  %v484_v33 = vld [vmem:[%s1778_s6 + $0x3f0] sm:$0xff] }
  0xdb   : > { %855 = vmatprep.mubr.f32.mxu1 %v425_v35 }
  0xdd   : > { %631 = vmatmul.mubr.f32.gmra.mrb[32].mxu0 %v422_v36  ;;  %v1951_v36 = vld [vmem:[%s2078_s2] ss:$0 sm:$0xff] }
  0xde   : > { %856 = vmatmul.mubr.f32.gmra.mrb[32].mxu1 %v424_v37  ;;  %635 = vmatprep.mubr.f32.mxu0 %v427_v38 }
  0xdf   : > { %860 = vmatprep.mubr.f32.mxu1 %v429_v39 }
  0xe1   : > { %636 = vmatmul.mubr.f32.gmra.mrb[34].mxu0 %v426_v40 }
  0xe2   : > { %861 = vmatmul.mubr.f32.gmra.mrb[34].mxu1 %v428_v41  ;;  %640 = vmatprep.mubr.f32.mxu0 %v431_v42 }
  0xe3   : > { %865 = vmatprep.mubr.f32.mxu1 %v433_v0 }
  0xe5   : > { %641 = vmatmul.mubr.f32.gmra.mrb[36].mxu0 %v430_v43 }
  0xe6   : > { %866 = vmatmul.mubr.f32.gmra.mrb[36].mxu1 %v432_v44  ;;  %645 = vmatprep.mubr.f32.mxu0 %v435_v45 }
  0xe7   : > { %870 = vmatprep.mubr.f32.mxu1 %v437_v46 }
  0xe9   : > { %646 = vmatmul.mubr.f32.gmra.mrb[38].mxu0 %v434_v47 }
  0xea   : > { %871 = vmatmul.mubr.f32.gmra.mrb[38].mxu1 %v436_v48  ;;  %650 = vmatprep.mubr.f32.mxu0 %v439_v49 }
  0xeb   : > { %875 = vmatprep.mubr.f32.mxu1 %v441_v50 }
  0xed   : > { %651 = vmatmul.mubr.f32.gmra.mrb[40].mxu0 %v438_v51 }
  0xee   : > { %876 = vmatmul.mubr.f32.gmra.mrb[40].mxu1 %v440_v52  ;;  %655 = vmatprep.mubr.f32.mxu0 %v443_v53 }
  0xef   : > { %880 = vmatprep.mubr.f32.mxu1 %v445_v54 }
  0xf1   : > { %656 = vmatmul.mubr.f32.gmra.mrb[42].mxu0 %v442_v55 }
  0xf2   : > { %881 = vmatmul.mubr.f32.gmra.mrb[42].mxu1 %v444_v56  ;;  %660 = vmatprep.mubr.f32.mxu0 %v447_v57 }
  0xf3   : > { %885 = vmatprep.mubr.f32.mxu1 %v449_v58 }
  0xf5   : > { %661 = vmatmul.mubr.f32.gmra.mrb[44].mxu0 %v446_v59 }
  0xf6   : > { %886 = vmatmul.mubr.f32.gmra.mrb[44].mxu1 %v448_v60  ;;  %665 = vmatprep.mubr.f32.mxu0 %v451_v61 }
  0xf7   : > { %890 = vmatprep.mubr.f32.mxu1 %v453_v62 }
  0xf9   : > { %666 = vmatmul.mubr.f32.gmra.mrb[46].mxu0 %v450_v63 }
  0xfa   : > { %891 = vmatmul.mubr.f32.gmra.mrb[46].mxu1 %v452_v1  ;;  %670 = vmatprep.mubr.f32.mxu0 %v455_v2 }
  0xfb   : > { %895 = vmatprep.mubr.f32.mxu1 %v457_v3 }
  0xfd   : > { %671 = vmatmul.mubr.f32.gmra.mrb[48].mxu0 %v454_v4 }
  0xfe   : > { %896 = vmatmul.mubr.f32.gmra.mrb[48].mxu1 %v456_v5  ;;  %675 = vmatprep.mubr.f32.mxu0 %v459_v6 }
  0xff   : > { %900 = vmatprep.mubr.f32.mxu1 %v461_v7 }
 0x101   : > { %676 = vmatmul.mubr.f32.gmra.mrb[50].mxu0 %v458_v8 }
 0x102   : > { %901 = vmatmul.mubr.f32.gmra.mrb[50].mxu1 %v460_v9  ;;  %680 = vmatprep.mubr.f32.mxu0 %v463_v10 }
 0x103   : > { %905 = vmatprep.mubr.f32.mxu1 %v465_v11 }
 0x105   : > { %681 = vmatmul.mubr.f32.gmra.mrb[52].mxu0 %v462_v12 }
 0x106   : > { %906 = vmatmul.mubr.f32.gmra.mrb[52].mxu1 %v464_v13  ;;  %685 = vmatprep.mubr.f32.mxu0 %v467_v14 }
 0x107   : > { %910 = vmatprep.mubr.f32.mxu1 %v469_v15 }
 0x109   : > { %686 = vmatmul.mubr.f32.gmra.mrb[54].mxu0 %v466_v16 }
 0x10a   : > { %911 = vmatmul.mubr.f32.gmra.mrb[54].mxu1 %v468_v17  ;;  %690 = vmatprep.mubr.f32.mxu0 %v471_v18 }
 0x10b   : > { %915 = vmatprep.mubr.f32.mxu1 %v473_v19 }
 0x10d   : > { %691 = vmatmul.mubr.f32.gmra.mrb[56].mxu0 %v470_v20 }
 0x10e   : > { %916 = vmatmul.mubr.f32.gmra.mrb[56].mxu1 %v472_v21  ;;  %695 = vmatprep.mubr.f32.mxu0 %v475_v22 }
 0x10f   : > { %920 = vmatprep.mubr.f32.mxu1 %v477_v23 }
 0x111   : > { %696 = vmatmul.mubr.f32.gmra.mrb[58].mxu0 %v474_v24 }
 0x112   : > { %921 = vmatmul.mubr.f32.gmra.mrb[58].mxu1 %v476_v25  ;;  %700 = vmatprep.mubr.f32.mxu0 %v479_v26 }
 0x113   : > { %925 = vmatprep.mubr.f32.mxu1 %v481_v27 }
 0x115   : > { %701 = vmatmul.mubr.f32.gmra.mrb[60].mxu0 %v478_v28 }
 0x116   : > { %926 = vmatmul.mubr.f32.gmra.mrb[60].mxu1 %v480_v29  ;;  %705 = vmatprep.mubr.f32.mxu0 %v483_v30 }
 0x117   : > { %930 = vmatprep.mubr.f32.mxu1 %v485_v31 }
 0x119   : > { %706 = vmatmul.mubr.f32.gmra.mrb[62].mxu0 %v482_v32 }
 0x11a   : > { %931 = vmatmul.mubr.f32.gmra.mrb[62].mxu1 %v484_v33 }
 0x170   : > { %v552_v34 = vpop.f32.mrb[0].mxu0 }
 0x171   : > { %v777_v35 = vpop.f32.mrb[0].mxu1  ;;  %v554_v37 = vpop.f32.mrb[1].mxu0 }
 0x172   : > { %v778_v38 = vadd.f32 %v777_v35, %v552_v34  ;;  %v779_v39 = vpop.f32.mrb[1].mxu1 }
 0x174   : > { %v1042_v40 = vadd.f32 %v1951_v36, %v778_v38  ;;  %v557_v41 = vpop.f32.mrb[2].mxu0 }
 0x175   : > { %v782_v42 = vpop.f32.mrb[2].mxu1  ;;  %v559_v0 = vpop.f32.mrb[3].mxu0 }
 0x176   : > { %v1074_v43 = vmax.f32 %v1042_v40, 0.0  ;;  %v783_v44 = vadd.f32 %v782_v42, %v557_v41  ;;  %v784_v45 = vpop.f32.mrb[3].mxu1 }
 0x178   : > { %1106 = vst [vmem:[%s1955_s9] sm:$0xff] %v1074_v43  ;;  %v1043_v46 = vadd.f32 %v1951_v36, %v783_v44  ;;  %v562_v47 = vpop.f32.mrb[4].mxu0 }
 0x179   : > { %v787_v48 = vpop.f32.mrb[4].mxu1  ;;  %v564_v49 = vpop.f32.mrb[5].mxu0 }
 0x17a   : > { %v1075_v50 = vmax.f32 %v1043_v46, 0.0  ;;  %v788_v51 = vadd.f32 %v787_v48, %v562_v47  ;;  %v789_v52 = vpop.f32.mrb[5].mxu1 }
 0x17c   : > { %1107 = vst [vmem:[%s1955_s9 + $0x8] sm:$0xff] %v1075_v50  ;;  %v1044_v53 = vadd.f32 %v1951_v36, %v788_v51  ;;  %v567_v54 = vpop.f32.mrb[6].mxu0 }
 0x17d   : > { %v792_v55 = vpop.f32.mrb[6].mxu1  ;;  %v569_v56 = vpop.f32.mrb[7].mxu0 }
 0x17e   : > { %v1076_v57 = vmax.f32 %v1044_v53, 0.0  ;;  %v793_v58 = vadd.f32 %v792_v55, %v567_v54  ;;  %v794_v59 = vpop.f32.mrb[7].mxu1 }
 0x180   : > { %1108 = vst [vmem:[%s1955_s9 + $0x10] sm:$0xff] %v1076_v57  ;;  %v1045_v60 = vadd.f32 %v1951_v36, %v793_v58  ;;  %v572_v61 = vpop.f32.mrb[8].mxu0 }
 0x181   : > { %v797_v62 = vpop.f32.mrb[8].mxu1  ;;  %v574_v63 = vpop.f32.mrb[9].mxu0 }
 0x182   : > { %v1077_v1 = vmax.f32 %v1045_v60, 0.0  ;;  %v798_v2 = vadd.f32 %v797_v62, %v572_v61  ;;  %v799_v3 = vpop.f32.mrb[9].mxu1 }
 0x184   : > { %1109 = vst [vmem:[%s1955_s9 + $0x18] sm:$0xff] %v1077_v1  ;;  %v1046_v4 = vadd.f32 %v1951_v36, %v798_v2  ;;  %v577_v5 = vpop.f32.mrb[10].mxu0 }
 0x185   : > { %v802_v6 = vpop.f32.mrb[10].mxu1  ;;  %v579_v7 = vpop.f32.mrb[11].mxu0 }
 0x186   : > { %v1078_v8 = vmax.f32 %v1046_v4, 0.0  ;;  %v803_v9 = vadd.f32 %v802_v6, %v577_v5  ;;  %v804_v10 = vpop.f32.mrb[11].mxu1 }
 0x188   : > { %1110 = vst [vmem:[%s1955_s9 + $0x20] sm:$0xff] %v1078_v8  ;;  %v1047_v11 = vadd.f32 %v1951_v36, %v803_v9  ;;  %v582_v12 = vpop.f32.mrb[12].mxu0 }
 0x189   : > { %v807_v13 = vpop.f32.mrb[12].mxu1  ;;  %v584_v14 = vpop.f32.mrb[13].mxu0 }
 0x18a   : > { %v1079_v15 = vmax.f32 %v1047_v11, 0.0  ;;  %v808_v16 = vadd.f32 %v807_v13, %v582_v12  ;;  %v809_v17 = vpop.f32.mrb[13].mxu1 }
 0x18c   : > { %1111 = vst [vmem:[%s1955_s9 + $0x28] sm:$0xff] %v1079_v15  ;;  %v1048_v18 = vadd.f32 %v1951_v36, %v808_v16  ;;  %v587_v19 = vpop.f32.mrb[14].mxu0 }
 0x18d   : > { %v812_v20 = vpop.f32.mrb[14].mxu1  ;;  %v589_v21 = vpop.f32.mrb[15].mxu0 }
 0x18e   : > { %v1080_v22 = vmax.f32 %v1048_v18, 0.0  ;;  %v813_v23 = vadd.f32 %v812_v20, %v587_v19  ;;  %v814_v24 = vpop.f32.mrb[15].mxu1 }
 0x190   : > { %1112 = vst [vmem:[%s1955_s9 + $0x30] sm:$0xff] %v1080_v22  ;;  %v1049_v25 = vadd.f32 %v1951_v36, %v813_v23  ;;  %v592_v26 = vpop.f32.mrb[16].mxu0 }
 0x191   : > { %v817_v27 = vpop.f32.mrb[16].mxu1  ;;  %v594_v28 = vpop.f32.mrb[17].mxu0 }
 0x192   : > { %v1081_v29 = vmax.f32 %v1049_v25, 0.0  ;;  %v818_v30 = vadd.f32 %v817_v27, %v592_v26  ;;  %v819_v31 = vpop.f32.mrb[17].mxu1 }
 0x194   : > { %1113 = vst [vmem:[%s1955_s9 + $0x38] sm:$0xff] %v1081_v29  ;;  %v1050_v32 = vadd.f32 %v1951_v36, %v818_v30  ;;  %v597_v33 = vpop.f32.mrb[18].mxu0 }
 0x195   : > { %v822_v34 = vpop.f32.mrb[18].mxu1  ;;  %v599_v35 = vpop.f32.mrb[19].mxu0 }
 0x196   : > { %v1082_v37 = vmax.f32 %v1050_v32, 0.0  ;;  %v823_v38 = vadd.f32 %v822_v34, %v597_v33  ;;  %v824_v39 = vpop.f32.mrb[19].mxu1 }
 0x198   : > { %1114 = vst [vmem:[%s1955_s9 + $0x40] sm:$0xff] %v1082_v37  ;;  %v1051_v40 = vadd.f32 %v1951_v36, %v823_v38  ;;  %v602_v41 = vpop.f32.mrb[20].mxu0 }
 0x199   : > { %v827_v42 = vpop.f32.mrb[20].mxu1  ;;  %v604_v0 = vpop.f32.mrb[21].mxu0 }
 0x19a   : > { %v1083_v43 = vmax.f32 %v1051_v40, 0.0  ;;  %v828_v44 = vadd.f32 %v827_v42, %v602_v41  ;;  %v829_v45 = vpop.f32.mrb[21].mxu1 }
 0x19c   : > { %1115 = vst [vmem:[%s1955_s9 + $0x48] sm:$0xff] %v1083_v43  ;;  %v1052_v46 = vadd.f32 %v1951_v36, %v828_v44  ;;  %v607_v47 = vpop.f32.mrb[22].mxu0 }
 0x19d   : > { %v832_v48 = vpop.f32.mrb[22].mxu1  ;;  %v609_v49 = vpop.f32.mrb[23].mxu0 }
 0x19e   : > { %v1084_v50 = vmax.f32 %v1052_v46, 0.0  ;;  %v833_v51 = vadd.f32 %v832_v48, %v607_v47  ;;  %v834_v52 = vpop.f32.mrb[23].mxu1 }
 0x1a0   : > { %1116 = vst [vmem:[%s1955_s9 + $0x50] sm:$0xff] %v1084_v50  ;;  %v1053_v53 = vadd.f32 %v1951_v36, %v833_v51  ;;  %v612_v54 = vpop.f32.mrb[24].mxu0 }
 0x1a1   : > { %v837_v55 = vpop.f32.mrb[24].mxu1  ;;  %v614_v56 = vpop.f32.mrb[25].mxu0 }
 0x1a2   : > { %v1085_v57 = vmax.f32 %v1053_v53, 0.0  ;;  %v838_v58 = vadd.f32 %v837_v55, %v612_v54  ;;  %v839_v59 = vpop.f32.mrb[25].mxu1 }
 0x1a4   : > { %1117 = vst [vmem:[%s1955_s9 + $0x58] sm:$0xff] %v1085_v57  ;;  %v1054_v60 = vadd.f32 %v1951_v36, %v838_v58  ;;  %v617_v61 = vpop.f32.mrb[26].mxu0 }
 0x1a5   : > { %v842_v62 = vpop.f32.mrb[26].mxu1  ;;  %v619_v63 = vpop.f32.mrb[27].mxu0 }
 0x1a6   : > { %v1086_v1 = vmax.f32 %v1054_v60, 0.0  ;;  %v843_v2 = vadd.f32 %v842_v62, %v617_v61  ;;  %v844_v3 = vpop.f32.mrb[27].mxu1 }
 0x1a8   : > { %1118 = vst [vmem:[%s1955_s9 + $0x60] sm:$0xff] %v1086_v1  ;;  %v1055_v4 = vadd.f32 %v1951_v36, %v843_v2  ;;  %v622_v5 = vpop.f32.mrb[28].mxu0 }
 0x1a9   : > { %v847_v6 = vpop.f32.mrb[28].mxu1  ;;  %v624_v7 = vpop.f32.mrb[29].mxu0 }
 0x1aa   : > { %v1087_v8 = vmax.f32 %v1055_v4, 0.0  ;;  %v848_v9 = vadd.f32 %v847_v6, %v622_v5  ;;  %v849_v10 = vpop.f32.mrb[29].mxu1 }
 0x1ac   : > { %1119 = vst [vmem:[%s1955_s9 + $0x68] sm:$0xff] %v1087_v8  ;;  %v1056_v11 = vadd.f32 %v1951_v36, %v848_v9  ;;  %v627_v12 = vpop.f32.mrb[30].mxu0 }
 0x1ad   : > { %v852_v13 = vpop.f32.mrb[30].mxu1  ;;  %v629_v14 = vpop.f32.mrb[31].mxu0 }
 0x1ae   : > { %v1088_v15 = vmax.f32 %v1056_v11, 0.0  ;;  %v853_v16 = vadd.f32 %v852_v13, %v627_v12  ;;  %v854_v17 = vpop.f32.mrb[31].mxu1 }
 0x1b0   : > { %1120 = vst [vmem:[%s1955_s9 + $0x70] sm:$0xff] %v1088_v15  ;;  %v1057_v18 = vadd.f32 %v1951_v36, %v853_v16  ;;  %v632_v19 = vpop.f32.mrb[32].mxu0 }
 0x1b1   : > { %v857_v20 = vpop.f32.mrb[32].mxu1  ;;  %v634_v21 = vpop.f32.mrb[33].mxu0 }
 0x1b2   : > { %v1089_v22 = vmax.f32 %v1057_v18, 0.0  ;;  %v858_v23 = vadd.f32 %v857_v20, %v632_v19  ;;  %v859_v24 = vpop.f32.mrb[33].mxu1 }
 0x1b4   : > { %1121 = vst [vmem:[%s1955_s9 + $0x78] sm:$0xff] %v1089_v22  ;;  %v1058_v25 = vadd.f32 %v1951_v36, %v858_v23  ;;  %v637_v26 = vpop.f32.mrb[34].mxu0 }
 0x1b5   : > { %v862_v27 = vpop.f32.mrb[34].mxu1  ;;  %v639_v28 = vpop.f32.mrb[35].mxu0 }
 0x1b6   : > { %v1090_v29 = vmax.f32 %v1058_v25, 0.0  ;;  %v863_v30 = vadd.f32 %v862_v27, %v637_v26  ;;  %v864_v31 = vpop.f32.mrb[35].mxu1 }
 0x1b8   : > { %1122 = vst [vmem:[%s1955_s9 + $0x80] sm:$0xff] %v1090_v29  ;;  %v1059_v32 = vadd.f32 %v1951_v36, %v863_v30  ;;  %v642_v33 = vpop.f32.mrb[36].mxu0 }
 0x1b9   : > { %v867_v34 = vpop.f32.mrb[36].mxu1  ;;  %v644_v35 = vpop.f32.mrb[37].mxu0 }
 0x1ba   : > { %v1091_v37 = vmax.f32 %v1059_v32, 0.0  ;;  %v868_v38 = vadd.f32 %v867_v34, %v642_v33  ;;  %v869_v39 = vpop.f32.mrb[37].mxu1 }
 0x1bc   : > { %1123 = vst [vmem:[%s1955_s9 + $0x88] sm:$0xff] %v1091_v37  ;;  %v1060_v40 = vadd.f32 %v1951_v36, %v868_v38  ;;  %v647_v41 = vpop.f32.mrb[38].mxu0 }
 0x1bd   : > { %v872_v42 = vpop.f32.mrb[38].mxu1  ;;  %v649_v0 = vpop.f32.mrb[39].mxu0 }
 0x1be   : > { %v1092_v43 = vmax.f32 %v1060_v40, 0.0  ;;  %v873_v44 = vadd.f32 %v872_v42, %v647_v41  ;;  %v874_v45 = vpop.f32.mrb[39].mxu1 }
 0x1c0   : > { %1124 = vst [vmem:[%s1955_s9 + $0x90] sm:$0xff] %v1092_v43  ;;  %v1061_v46 = vadd.f32 %v1951_v36, %v873_v44  ;;  %v652_v47 = vpop.f32.mrb[40].mxu0 }
 0x1c1   : > { %v877_v48 = vpop.f32.mrb[40].mxu1  ;;  %v654_v49 = vpop.f32.mrb[41].mxu0 }
 0x1c2   : > { %v1093_v50 = vmax.f32 %v1061_v46, 0.0  ;;  %v878_v51 = vadd.f32 %v877_v48, %v652_v47  ;;  %v879_v52 = vpop.f32.mrb[41].mxu1 }
 0x1c4   : > { %1125 = vst [vmem:[%s1955_s9 + $0x98] sm:$0xff] %v1093_v50  ;;  %v1062_v53 = vadd.f32 %v1951_v36, %v878_v51  ;;  %v657_v54 = vpop.f32.mrb[42].mxu0 }
 0x1c5   : > { %v882_v55 = vpop.f32.mrb[42].mxu1  ;;  %v659_v56 = vpop.f32.mrb[43].mxu0 }
 0x1c6   : > { %v1094_v57 = vmax.f32 %v1062_v53, 0.0  ;;  %v883_v58 = vadd.f32 %v882_v55, %v657_v54  ;;  %v884_v59 = vpop.f32.mrb[43].mxu1 }
 0x1c8   : > { %1126 = vst [vmem:[%s1955_s9 + $0xa0] sm:$0xff] %v1094_v57  ;;  %v1063_v60 = vadd.f32 %v1951_v36, %v883_v58  ;;  %v662_v61 = vpop.f32.mrb[44].mxu0 }
 0x1c9   : > { %v887_v62 = vpop.f32.mrb[44].mxu1  ;;  %v664_v63 = vpop.f32.mrb[45].mxu0 }
 0x1ca   : > { %v1095_v1 = vmax.f32 %v1063_v60, 0.0  ;;  %v888_v2 = vadd.f32 %v887_v62, %v662_v61  ;;  %v889_v3 = vpop.f32.mrb[45].mxu1 }
 0x1cc   : > { %1127 = vst [vmem:[%s1955_s9 + $0xa8] sm:$0xff] %v1095_v1  ;;  %v1064_v4 = vadd.f32 %v1951_v36, %v888_v2  ;;  %v667_v5 = vpop.f32.mrb[46].mxu0 }
 0x1cd   : > { %v892_v6 = vpop.f32.mrb[46].mxu1  ;;  %v669_v7 = vpop.f32.mrb[47].mxu0 }
 0x1ce   : > { %v1096_v8 = vmax.f32 %v1064_v4, 0.0  ;;  %v893_v9 = vadd.f32 %v892_v6, %v667_v5  ;;  %v894_v10 = vpop.f32.mrb[47].mxu1 }
 0x1d0   : > { %1128 = vst [vmem:[%s1955_s9 + $0xb0] sm:$0xff] %v1096_v8  ;;  %v1065_v11 = vadd.f32 %v1951_v36, %v893_v9  ;;  %v672_v12 = vpop.f32.mrb[48].mxu0 }
 0x1d1   : > { %v897_v13 = vpop.f32.mrb[48].mxu1  ;;  %v674_v14 = vpop.f32.mrb[49].mxu0 }
 0x1d2   : > { %v1097_v15 = vmax.f32 %v1065_v11, 0.0  ;;  %v898_v16 = vadd.f32 %v897_v13, %v672_v12  ;;  %v899_v17 = vpop.f32.mrb[49].mxu1 }
 0x1d4   : > { %1129 = vst [vmem:[%s1955_s9 + $0xb8] sm:$0xff] %v1097_v15  ;;  %v1066_v18 = vadd.f32 %v1951_v36, %v898_v16  ;;  %v677_v19 = vpop.f32.mrb[50].mxu0 }
 0x1d5   : > { %v902_v20 = vpop.f32.mrb[50].mxu1  ;;  %v679_v21 = vpop.f32.mrb[51].mxu0 }
 0x1d6   : > { %v1098_v22 = vmax.f32 %v1066_v18, 0.0  ;;  %v903_v23 = vadd.f32 %v902_v20, %v677_v19  ;;  %v904_v24 = vpop.f32.mrb[51].mxu1 }
 0x1d8   : > { %1130 = vst [vmem:[%s1955_s9 + $0xc0] sm:$0xff] %v1098_v22  ;;  %v1067_v25 = vadd.f32 %v1951_v36, %v903_v23  ;;  %v682_v26 = vpop.f32.mrb[52].mxu0 }
 0x1d9   : > { %v907_v27 = vpop.f32.mrb[52].mxu1  ;;  %v684_v28 = vpop.f32.mrb[53].mxu0 }
 0x1da   : > { %v1099_v29 = vmax.f32 %v1067_v25, 0.0  ;;  %v908_v30 = vadd.f32 %v907_v27, %v682_v26  ;;  %v909_v31 = vpop.f32.mrb[53].mxu1 }
 0x1dc   : > { %1131 = vst [vmem:[%s1955_s9 + $0xc8] sm:$0xff] %v1099_v29  ;;  %v1068_v32 = vadd.f32 %v1951_v36, %v908_v30  ;;  %v687_v33 = vpop.f32.mrb[54].mxu0 }
 0x1dd   : > { %v912_v34 = vpop.f32.mrb[54].mxu1  ;;  %v689_v35 = vpop.f32.mrb[55].mxu0 }
 0x1de   : > { %v1100_v37 = vmax.f32 %v1068_v32, 0.0  ;;  %v913_v38 = vadd.f32 %v912_v34, %v687_v33  ;;  %v914_v39 = vpop.f32.mrb[55].mxu1 }
 0x1e0   : > { %1132 = vst [vmem:[%s1955_s9 + $0xd0] sm:$0xff] %v1100_v37  ;;  %v1069_v40 = vadd.f32 %v1951_v36, %v913_v38  ;;  %v692_v41 = vpop.f32.mrb[56].mxu0 }
 0x1e1   : > { %v917_v42 = vpop.f32.mrb[56].mxu1  ;;  %v694_v0 = vpop.f32.mrb[57].mxu0 }
 0x1e2   : > { %v1101_v43 = vmax.f32 %v1069_v40, 0.0  ;;  %v918_v44 = vadd.f32 %v917_v42, %v692_v41  ;;  %v919_v45 = vpop.f32.mrb[57].mxu1 }
 0x1e4   : > { %1133 = vst [vmem:[%s1955_s9 + $0xd8] sm:$0xff] %v1101_v43  ;;  %v1070_v46 = vadd.f32 %v1951_v36, %v918_v44  ;;  %v697_v47 = vpop.f32.mrb[58].mxu0 }
 0x1e5   : > { %v922_v48 = vpop.f32.mrb[58].mxu1  ;;  %v699_v49 = vpop.f32.mrb[59].mxu0 }
 0x1e6   : > { %v1102_v50 = vmax.f32 %v1070_v46, 0.0  ;;  %v923_v51 = vadd.f32 %v922_v48, %v697_v47  ;;  %v924_v52 = vpop.f32.mrb[59].mxu1 }
 0x1e8   : > { %1134 = vst [vmem:[%s1955_s9 + $0xe0] sm:$0xff] %v1102_v50  ;;  %v1071_v53 = vadd.f32 %v1951_v36, %v923_v51  ;;  %v702_v54 = vpop.f32.mrb[60].mxu0 }
 0x1e9   : > { %v927_v55 = vpop.f32.mrb[60].mxu1  ;;  %v704_v56 = vpop.f32.mrb[61].mxu0 }
 0x1ea   : > { %v1103_v57 = vmax.f32 %v1071_v53, 0.0  ;;  %v928_v58 = vadd.f32 %v927_v55, %v702_v54  ;;  %v929_v59 = vpop.f32.mrb[61].mxu1 }
 0x1ec   : > { %1135 = vst [vmem:[%s1955_s9 + $0xe8] sm:$0xff] %v1103_v57  ;;  %v1072_v60 = vadd.f32 %v1951_v36, %v928_v58  ;;  %v707_v61 = vpop.f32.mrb[62].mxu0 }
 0x1ed   : > { %v932_v62 = vpop.f32.mrb[62].mxu1  ;;  %v709_v63 = vpop.f32.mrb[63].mxu0 }
 0x1ee   : > { %v1104_v1 = vmax.f32 %v1072_v60, 0.0  ;;  %v933_v2 = vadd.f32 %v932_v62, %v707_v61  ;;  %v934_v3 = vpop.f32.mrb[63].mxu1 }
 0x1f0   : > { %1136 = vst [vmem:[%s1955_s9 + $0xf0] sm:$0xff] %v1104_v1  ;;  %v1073_v4 = vadd.f32 %v1951_v36, %v933_v2 }
 0x1f2   : > { %v1105_v5 = vmax.f32 %v1073_v4, 0.0 }
 0x1f4   : > { %1137 = vst [vmem:[%s1955_s9 + $0xf8] sm:$0xff] %v1105_v5 }
 0x1f5   : > { %1517 = shalt.err (!%p1514_p5)
}
 0x1f6   : > { %s1518_s29 = scalar_lea.hbm %s2024_s7, 4096  ;;  %s1522_s20 = scalar_lea.hbm %s2079_s3, 8192 }
 0x1f7   : > { %p1519_p9 = scmp.ne.s32.totalorder %s2024_s7, %s1518_s29  ;;  %p1523_p3 = scmp.lt.u32.totalorder %s2024_s7, %s2079_s3 }
 0x1f8   : > { %p1524_p7 = scmp.lt.u32.totalorder %s1522_s20, %s1518_s29  ;;  %p1526_p4 = scmp.lt.u32.totalorder %s1518_s29, %s2024_s7 }
 0x1f9   : > { %p1520_p1 = pnand %p1519_p9, %p1718_p10 }
 0x1fa   : > { %p1525_p13 = por %p1524_p7, %p1523_p3 }
 0x1fb   : > { %p1521_p2 = pneg %p1520_p1 }
 0x1fc   : > { %p1527_p6 = por %p1526_p4, %p1525_p13 }
 0x1fe   : > { %p1528_p8 = pnand %p1527_p6, %p1521_p2 }
 0x200   : > { %1531 = shalt.err (!%p1528_p8)
}
 0x201   : > { %s1600_s9 = smov 128   ;;  %s1601_s10 = smov 8  }
 0x202   : > { %1372 = dma.vmem_to_hbm [thread:$0]  (%p1718_p10), %s2026_s11, 4096, %s2024_s7, %s1139_s8, %s1600_s9, %s1600_s9, %s1601_s10  }
 0x203 PF: > { %s1167_s18 = sand.u32 1, %s1570_s12   ;;  %p2097_p12 = scmp.ne.s32.totalorder %s2087_s23, 0 }
 0x204   : > { %p2098_p11 = scmp.ge.s32.totalorder %s1590_s17, 2  ;;  %s1168_s26 = scalar_lea.sflag [#allocation5], %s1167_s18 }
 0x206   : > { %p1383_p0 = pnand %p2098_p11, %p2097_p12 }
 0x208   : > { %1565 = dma.done.wait (!%p1383_p0), %s1168_s26, 4096  }
 0x209   : > { %1567 = vsyncadd (!%p1383_p0), %s1168_s26, 4294963200  ;;  %s20_s17 = sadd.s32 1, %s1590_s17   ;;  %s2099_s12 = smov %s1574_s13 }
 0x20a   : > { %p17_p5 = scmp.ge.s32.totalorder %s20_s17, 4   ;;  %s2100_s13 = smov %s1578_s14 }
 0x20b   : > { %s2101_s14 = smov %s1727_s5  ;;  %s2102_s15 = smov %s1586_s16 }
 0x20c   : > { %s2103_s16 = smov %s2105_s28  ;;  %19 = sbr.rel (!%p17_p5) target bundleno = 7 (0x7), region = 90 }
 0x213   :  { %1173 = vsyncpa [#allocation4], 1 }
 0x214   :  { %1175 = vsyncpa [#allocation4 + $0x1], 1 }
 0x215   :  { %1176 = vsyncpa [#allocation7], 1 }
 0x216   :  { %1177 = vsyncpa [#allocation5], 1 }
 0x217   :  { %1179 = vsyncpa [#allocation5 + $0x1], 1 }

</bundles_post_ra>
